<compile_context>
chip_gen: v5e
topology: v5e:2x2
jax: 0.10.0
libtpu: 0.0.40
codegen_flags: <defaults>
</compile_context>

<pallas_src>
import functools

import jax
import jax.numpy as jnp
from jax.experimental import pallas as pl
from jax.experimental.pallas import tpu as pltpu


def _round_up(x, m):
    return ((x + m - 1) // m) * m


def mirt_kernel(theta_ref, a_raw_ref, b_ref, out_ref):
    # Upcast immediately on load (v5e has no bf16 VALU/EUP); all math in f32.
    theta = theta_ref[...].astype(jnp.float32)               # (D, TB)
    a = jax.nn.sigmoid(a_raw_ref[...].astype(jnp.float32))   # (D, TB), exp on EUP
    b = b_ref[...]                                            # (1, TB) f32
    # Reduce over the latent (sublane) axis -> lane-dense (1, TB) result.
    z = jnp.sum(a * theta, axis=0, keepdims=True)             # (1, TB)
    # irt2pl: 1/(1+exp(-z+b)) == sigmoid(z - b)
    out_ref[...] = jax.nn.sigmoid(z - b)                      # lane-dense store


@functools.partial(jax.jit, static_argnames=("use_bf16",))
def mirt_forward(theta_emb, a_emb, b_emb, user, item, *, use_bf16=True):
    """Plain-JAX gathers + transposed, batch-tiled Pallas hot path."""
    B = user.shape[0]
    D = theta_emb.shape[1]
    in_dtype = jnp.bfloat16 if use_bf16 else jnp.float32
    bytes_per_elt = jnp.dtype(in_dtype).itemsize

    # --- tile selection: batch rides on lanes, TB is a multiple of 128 ---
    TB = min(8192, _round_up(B, 128))
    # Keep each (D, TB) input tile <= ~4 MiB so 2 inputs x 2 pipeline buffers stay
    # well under the v7x 32 MiB scoped-VMEM default (v5e/v6e have more headroom).
    max_tile_bytes = 4 * 1024 * 1024
    while TB > 128 and D * TB * bytes_per_elt > max_tile_bytes:
        TB = max(128, (TB // 2 // 128) * 128)
    B_pad = _round_up(B, TB)

    # --- pad indices (index 0 is valid) and gather; transpose to (D, B_pad) ---
    pad = B_pad - B
    user_p = jnp.pad(user, (0, pad))
    item_p = jnp.pad(item, (0, pad))
    theta_t = theta_emb[user_p].astype(in_dtype).T            # (D, B_pad)
    a_t = a_emb[item_p].astype(in_dtype).T                    # (D, B_pad)
    b_row = b_emb[item_p].astype(jnp.float32).T               # (1, B_pad)

    grid = (B_pad // TB,)
    out = pl.pallas_call(
        mirt_kernel,
        out_shape=jax.ShapeDtypeStruct((1, B_pad), jnp.float32),
        grid=grid,
        in_specs=[
            pl.BlockSpec((D, TB), lambda i: (0, i)),
            pl.BlockSpec((D, TB), lambda i: (0, i)),
            pl.BlockSpec((1, TB), lambda i: (0, i)),
        ],
        out_specs=pl.BlockSpec((1, TB), lambda i: (0, i)),
        compiler_params=pltpu.CompilerParams(
            dimension_semantics=("parallel",),
        ),
    )(theta_t, a_t, b_row)
    return out[0, :B]                                         # (B,), matches torch squeeze


def reference_forward(theta_emb, a_emb, b_emb, user, item, *, input_dtype=jnp.float32):
    # Pure-JAX reference of MIRTNet.forward / irt2pl, optionally mimicking the
    # bf16 rounding the kernel applies to its HBM inputs.
    theta = theta_emb[user].astype(input_dtype).astype(jnp.float32)
    a = jax.nn.sigmoid(a_emb[item].astype(input_dtype).astype(jnp.float32))
    b = b_emb[item][:, 0]
    return 1.0 / (1.0 + jnp.exp(-jnp.sum(a * theta, axis=-1) + b))


if __name__ == "__main__":
    # Deterministic synthetic parameters (shapes per MIRTNet.__init__).
    user_num, item_num, latent_dim = 10, 20, 32
    batch = 8

    key = jax.random.PRNGKey(0)
    k_theta, k_a, k_b, k_u, k_i = jax.random.split(key, 5)
    theta_emb = jax.random.normal(k_theta, (user_num, latent_dim), jnp.float32)
    a_emb = jax.random.normal(k_a, (item_num, latent_dim), jnp.float32)
    b_emb = jax.random.normal(k_b, (item_num, 1), jnp.float32)

    user = jax.random.randint(k_u, (batch,), 0, user_num)
    item = jax.random.randint(k_i, (batch,), 0, item_num)

    out = jax.block_until_ready(
        mirt_forward(theta_emb, a_emb, b_emb, user, item, use_bf16=True)
    )
    # Tight check against a reference fed the same bf16-rounded inputs
    # (the math itself is identical to the PyTorch forward).
    ref = reference_forward(theta_emb, a_emb, b_emb, user, item,
                            input_dtype=jnp.bfloat16)

    assert out.shape == (batch,)
    assert jnp.allclose(out, ref, atol=1e-4, rtol=1e-4), (out, ref)
    print("KERNEL_OK")
</pallas_src>

<mosaic_0001>
module attributes {stable_mosaic.version = 11 : i64} {
  func.func @mirt_kernel(%arg0: i32, %arg1: memref<32x128xbf16, #tpu.memory_space<vmem>>, %arg2: memref<32x128xbf16, #tpu.memory_space<vmem>>, %arg3: memref<1x128xf32, #tpu.memory_space<vmem>>, %arg4: memref<1x128xf32, #tpu.memory_space<vmem>>) attributes {dimension_semantics = [#tpu.dimension_semantics<parallel>], iteration_bounds = array<i64: 1>, scalar_prefetch = 0 : i64, scratch_operands = 0 : i64, tpu.core_type = #tpu.core_type<tc>, window_params = [{transform_indices = @transform_0, window_bounds = array<i64: 32, 128>}, {transform_indices = @transform_1, window_bounds = array<i64: 32, 128>}, {transform_indices = @transform_2, window_bounds = array<i64: 1, 128>}, {transform_indices = @transform_3, window_bounds = array<i64: 1, 128>}]} {
    %c0 = arith.constant 0 : index
    %c0_0 = arith.constant 0 : index
    %0 = vector.load %arg1[%c0, %c0_0] : memref<32x128xbf16, #tpu.memory_space<vmem>>, vector<32x128xbf16>
    %1 = arith.extf %0 : vector<32x128xbf16> to vector<32x128xf32>
    %c0_1 = arith.constant 0 : index
    %c0_2 = arith.constant 0 : index
    %2 = vector.load %arg2[%c0_1, %c0_2] : memref<32x128xbf16, #tpu.memory_space<vmem>>, vector<32x128xbf16>
    %3 = arith.extf %2 : vector<32x128xbf16> to vector<32x128xf32>
    %4 = arith.negf %3 : vector<32x128xf32>
    %5 = math.exp %4 : vector<32x128xf32>
    %cst = arith.constant 1.000000e+00 : f32
    %6 = vector.broadcast %cst : f32 to vector<32x128xf32>
    %7 = arith.addf %6, %5 : vector<32x128xf32>
    %8 = arith.divf %6, %7 : vector<32x128xf32>
    %c0_3 = arith.constant 0 : index
    %c0_4 = arith.constant 0 : index
    %9 = vector.load %arg3[%c0_3, %c0_4] : memref<1x128xf32, #tpu.memory_space<vmem>>, vector<1x128xf32>
    %10 = arith.mulf %8, %1 : vector<32x128xf32>
    %cst_5 = arith.constant dense<0.000000e+00> : vector<128xf32>
    %11 = vector.multi_reduction <add>, %10, %cst_5 [0] : vector<32x128xf32> to vector<128xf32>
    %12 = vector.shape_cast %11 : vector<128xf32> to vector<1x128xf32>
    %13 = arith.subf %12, %9 : vector<1x128xf32>
    %14 = arith.negf %13 : vector<1x128xf32>
    %15 = math.exp %14 : vector<1x128xf32>
    %cst_6 = arith.constant 1.000000e+00 : f32
    %16 = vector.broadcast %cst_6 : f32 to vector<1x128xf32>
    %17 = arith.addf %16, %15 : vector<1x128xf32>
    %18 = arith.divf %16, %17 : vector<1x128xf32>
    %c0_7 = arith.constant 0 : index
    %c0_8 = arith.constant 0 : index
    %19 = vector.load %arg4[%c0_7, %c0_8] : memref<1x128xf32, #tpu.memory_space<vmem>>, vector<1x128xf32>
    tpu.vector_store %arg4[%c0_7, %c0_8], %18 {strides = array<i32>} : memref<1x128xf32, #tpu.memory_space<vmem>>, vector<1x128xf32>,
    return
  }
  func.func @transform_0(%arg0: i32) -> (i32, i32) {
    %c0_i32 = arith.constant 0 : i32
    %c0_i32_0 = arith.constant 0 : i32
    return %c0_i32, %arg0 : i32, i32
  }
  func.func @transform_1(%arg0: i32) -> (i32, i32) {
    %c0_i32 = arith.constant 0 : i32
    %c0_i32_0 = arith.constant 0 : i32
    return %c0_i32, %arg0 : i32, i32
  }
  func.func @transform_2(%arg0: i32) -> (i32, i32) {
    %c0_i32 = arith.constant 0 : i32
    %c0_i32_0 = arith.constant 0 : i32
    return %c0_i32, %arg0 : i32, i32
  }
  func.func @transform_3(%arg0: i32) -> (i32, i32) {
    %c0_i32 = arith.constant 0 : i32
    %c0_i32_0 = arith.constant 0 : i32
    return %c0_i32, %arg0 : i32, i32
  }
}

</mosaic_0001>

<bundles_post_ra>
// kernel: mirt_forward.1
= control target key start
LH: loop header
LB: loop body
LE: loop exit
PB: predicated region body
PF: predicated region fallthrough
CT: control target
= control target key end

     0   :  { %s263_s1 = inlined_call_operand.vmem [shape: bf16[32,128], index: 1, kind: input, shape index: {}]   ;;  %s264_s0 = inlined_call_operand.vmem [shape: bf16[32,128], index: 0, kind: input, shape index: {}]   ;;  %s265_s2 = inlined_call_operand.vmem [shape: f32[1,128], index: 2, kind: input, shape index: {}]   ;;  %s266_s3 = inlined_call_operand.vmem [shape: f32[1,128], index: 3, kind: output, shape index: {}]  }
   0x1   :  { %v159_v0 = vld [vmem:[%s263_s1] sm:$0xff]   ;;  %v167_v1 = vld [vmem:[%s263_s1 + $0x8] sm:$0xff]  }
   0x2   :  { %v160_v2 = vunpack.c.l.bf16 %v159_v0  ;;  %v161_v3 = vunpack.c.h.bf16 %v159_v0  ;;  %v164_v4 = vunpack.c.l.bf16 %v167_v1  ;;  %v165_v5 = vunpack.c.h.bf16 %v167_v1  ;;  %v217_v18 = vld [vmem:[%s264_s0] sm:$0xff]   ;;  %v222_v19 = vld [vmem:[%s264_s0 + $0x8] sm:$0xff]  }
   0x3   :  { %v152_v23 = vunpack.c.l.bf16 %v217_v18  ;;  %v153_v24 = vunpack.c.h.bf16 %v217_v18  ;;  %v156_v25 = vunpack.c.l.bf16 %v222_v19  ;;  %v157_v52 = vunpack.c.h.bf16 %v222_v19 }
   0x4   :  { %v145_v6 = vmul.f32 -1.442695, %v160_v2  ;;  %v146_v7 = vmul.f32 -1.442695, %v161_v3  ;;  %v147_v8 = vmul.f32 -1.442695, %v164_v4 }
   0x5   :  { %v148_v9 = vmul.f32 -1.442695, %v165_v5 }
   0x6   :  { %168 = vpow2.f32 %v145_v6 }
   0x7   :  { %170 = vpow2.f32 %v146_v7 }
   0x8   :  { %172 = vpow2.f32 %v147_v8 }
   0x9   :  { %174 = vpow2.f32 %v148_v9 }
   0xc   :  { %v169_v10 = vpop.eup %168 }
   0xd   :  { %v171_v11 = vpop.eup %170  ;;  %v42_v12 = vadd.f32 1.0, %v169_v10 }
   0xe   :  { %v173_v13 = vpop.eup %172  ;;  %v43_v14 = vadd.f32 1.0, %v171_v11 }
   0xf   :  { %v175_v15 = vpop.eup %174  ;;  %v44_v16 = vadd.f32 1.0, %v173_v13  ;;  %176 = vrcp.f32 %v42_v12  ;;  %v55_v20 = vand.u32 2147483647, %v42_v12  ;;  %v57_v21 = vand.u32 2147483648, %v42_v12 }
  0x10   :  { %v45_v17 = vadd.f32 1.0, %v175_v15  ;;  %178 = vrcp.f32 %v43_v14  ;;  %v72_v26 = vand.u32 2147483648, %v43_v14  ;;  %vm51_vm0 = vweird.f32 %v42_v12 }
  0x11   :  { %180 = vrcp.f32 %v44_v16  ;;  %vm227_vm1 = vcmp.eq.f32.partialorder %v55_v20, 8.507059e+37  ;;  %vm66_vm2 = vweird.f32 %v43_v14  ;;  %v58_v31 = vor.u32 1.1754944e-38, %v57_v21 }
  0x12   :  { %182 = vrcp.f32 %v45_v17  ;;  %v70_v33 = vand.u32 2147483647, %v43_v14  ;;  %vm81_vm3 = vweird.f32 %v44_v16  ;;  %v85_v36 = vand.u32 2147483647, %v44_v16 }
  0x13   :  { %v73_v39 = vor.u32 1.1754944e-38, %v72_v26  ;;  %v87_v40 = vand.u32 2147483648, %v44_v16  ;;  %vm96_vm8 = vweird.f32 %v45_v17  ;;  %v100_v46 = vand.u32 2147483647, %v45_v17 }
  0x14   :  { %v102_v47 = vand.u32 2147483648, %v45_v17  ;;  %vm71_vm11 = vcmp.eq.f32.partialorder %v70_v33, 8.507059e+37  ;;  %vm86_vm13 = vcmp.eq.f32.partialorder %v85_v36, 8.507059e+37 }
  0x15   :  { %v177_v22 = vpop.eup %176  ;;  %v88_v55 = vor.u32 1.1754944e-38, %v87_v40  ;;  %vm101_vm15 = vcmp.eq.f32.partialorder %v100_v46, 8.507059e+37 }
  0x16   :  { %v179_v27 = vpop.eup %178  ;;  %v47_v28 = vmul.f32 %v177_v22, %v42_v12  ;;  %vm52_vm4 = vweird.f32 %v177_v22  ;;  %v103_v61 = vor.u32 1.1754944e-38, %v102_v47 }
  0x17   :  { %v181_v30 = vpop.eup %180  ;;  %v62_v32 = vmul.f32 %v179_v27, %v43_v14  ;;  %vm67_vm5 = vweird.f32 %v179_v27  ;;  %vm232_vm7 = vmor %vm51_vm0, %vm52_vm4 }
  0x18   :  { %v48_v34 = vsub.f32 1.0, %v47_v28  ;;  %v77_v35 = vmul.f32 %v181_v30, %v44_v16  ;;  %v183_v37 = vpop.eup %182  ;;  %vm82_vm6 = vweird.f32 %v181_v30  ;;  %vm237_vm9 = vmor %vm66_vm2, %vm67_vm5  ;;  %v106_v16 = vld [vmem:[%s265_s2] sm:$0x1] }
  0x19   :  { %v63_v38 = vsub.f32 1.0, %v62_v32  ;;  %v92_v43 = vmul.f32 %v183_v37, %v45_v17  ;;  %vm97_vm10 = vweird.f32 %v183_v37  ;;  %vm244_vm12 = vmor %vm81_vm3, %vm82_vm6 }
  0x1a   :  { %v49_v41 = vmul.f32 %v177_v22, %v48_v34  ;;  %v78_v42 = vsub.f32 1.0, %v77_v35  ;;  %vm98_vm14 = vmor %vm96_vm8, %vm97_vm10 }
  0x1b   :  { %v64_v45 = vmul.f32 %v179_v27, %v63_v38  ;;  %v93_v51 = vsub.f32 1.0, %v92_v43 }
  0x1c   :  { %v50_v48 = vadd.f32 %v177_v22, %v49_v41  ;;  %v79_v50 = vmul.f32 %v181_v30, %v78_v42 }
  0x1d   :  { %v65_v53 = vadd.f32 %v179_v27, %v64_v45  ;;  %v94_v58 = vmul.f32 %v183_v37, %v93_v51 }
  0x1e   :  { %v54_v56 = vsel %vm232_vm7, %v177_v22, %v50_v48  ;;  %v80_v57 = vadd.f32 %v181_v30, %v79_v50 }
  0x1f   :  { %v59_v59 = vsel %vm227_vm1, %v58_v31, %v54_v56  ;;  %v69_v60 = vsel %vm237_vm9, %v179_v27, %v65_v53  ;;  %v95_v0 = vadd.f32 %v183_v37, %v94_v58 }
  0x20   :  { %v74_v62 = vsel %vm71_vm11, %v73_v39, %v69_v60  ;;  %v84_v63 = vsel %vm244_vm12, %v181_v30, %v80_v57  ;;  %v107_v1 = vmul.f32 %v152_v23, %v59_v59 }
  0x21   :  { %v89_v2 = vsel %vm86_vm13, %v88_v55, %v84_v63  ;;  %v108_v3 = vmul.f32 %v153_v24, %v74_v62  ;;  %v99_v4 = vsel %vm98_vm14, %v183_v37, %v95_v0 }
  0x22   :  { %v109_v5 = vmul.f32 %v156_v25, %v89_v2  ;;  %v104_v6 = vsel %vm101_vm15, %v103_v61, %v99_v4 }
  0x23   :  { %v111_v7 = vadd.f32 %v108_v3, %v107_v1  ;;  %v110_v8 = vmul.f32 %v157_v52, %v104_v6 }
  0x25   :  { %v112_v9 = vadd.f32 %v111_v7, %v109_v5 }
  0x27   :  { %v113_v10 = vadd.f32 %v112_v9, %v110_v8 }
  0x29   :  { %v114_v11 = vrot.slane %v113_v10, 4 }
  0x2b   :  { %v115_v12 = vadd.f32 %v114_v11, %v113_v10 }
  0x2d   :  { %v116_v13 = vrot.slane %v115_v12, 2 }
  0x2f   :  { %v117_v14 = vadd.f32 %v116_v13, %v115_v12 }
  0x31   :  { %v118_v15 = vrot.slane %v117_v14, 1 }
  0x33   :  { %v119_v17 = vadd.f32 %v118_v15, %v117_v14 }
  0x35   :  { %v120_v18 = vsub.f32 %v119_v17, %v106_v16 }
  0x37   :  { %v149_v19 = vmul.f32 -1.442695, %v120_v18 }
  0x39   :  { %184 = vpow2.f32 %v149_v19 }
  0x3f   :  { %v185_v20 = vpop.eup %184 }
  0x40   :  { %v124_v21 = vadd.f32 1.0, %v185_v20 }
  0x42   :  { %186 = vrcp.f32 %v124_v21  ;;  %v136_v24 = vand.u32 2147483648, %v124_v21  ;;  %vm130_vm0 = vweird.f32 %v124_v21  ;;  %v134_v26 = vand.u32 2147483647, %v124_v21 }
  0x44   :  { %v137_v28 = vor.u32 1.1754944e-38, %v136_v24  ;;  %vm135_vm3 = vcmp.eq.f32.partialorder %v134_v26, 8.507059e+37 }
  0x48   :  { %v187_v22 = vpop.eup %186 }
  0x49   :  { %v126_v23 = vmul.f32 %v187_v22, %v124_v21  ;;  %vm131_vm1 = vweird.f32 %v187_v22 }
  0x4a   :  { %vm132_vm2 = vmor %vm130_vm0, %vm131_vm1 }
  0x4b   :  { %v127_v25 = vsub.f32 1.0, %v126_v23 }
  0x4d   :  { %v128_v27 = vmul.f32 %v187_v22, %v127_v25 }
  0x4f   :  { %v129_v29 = vadd.f32 %v187_v22, %v128_v27 }
  0x51   :  { %v133_v30 = vsel %vm132_vm2, %v187_v22, %v129_v29 }
  0x52   :  { %v138_v31 = vsel %vm135_vm3, %v137_v28, %v133_v30 }
  0x53   :  { %140 = vst [vmem:[%s266_s3] sm:$0x1] %v138_v31 }

</bundles_post_ra>
